<compile_context>
chip_gen: v6e
topology: v6e:2x2x1
jax: 0.10.0
libtpu: 0.0.40
codegen_flags: <defaults>
</compile_context>

<pallas_src>
import functools

import jax
import jax.numpy as jnp
from jax.experimental import pallas as pl
from jax.experimental.pallas import tpu as pltpu


def _round_up(x: int, m: int) -> int:
    return (x + m - 1) // m * m


# ---------------------------------------------------------------------------
# Fused MLP kernel: all layers inside one pallas_call, activation stays on-chip.
# ---------------------------------------------------------------------------
def _fused_mlp_kernel(*refs, hidden_layers: int, compute_dtype):
    # refs = (x, w_in, b_in, [w_h0, b_h0, ..., w_h{L-1}, b_h{L-1}],
    #         w_out, b_out, o)
    x_ref = refs[0]
    w_in_ref, b_in_ref = refs[1], refs[2]
    hid_refs = refs[3:3 + 2 * hidden_layers]
    w_out_ref = refs[3 + 2 * hidden_layers]
    b_out_ref = refs[4 + 2 * hidden_layers]
    o_ref = refs[5 + 2 * hidden_layers]

    def dense(h, w_ref, b_ref, *, relu, last):
        # MXU matmul (LHS already in compute_dtype) with f32 accumulation;
        # bias-add + ReLU epilogue runs in f32 on the VPU (v5e has no bf16 VPU).
        y = jnp.dot(h, w_ref[...], preferred_element_type=jnp.float32)
        y = y + b_ref[...]                 # (1, N) broadcast over rows, f32
        if relu:
            y = jnp.maximum(y, 0.0)
        if last:
            return y                       # final layer stays f32 -> o_ref
        # Fused down-cast: inter-layer activation lives in compute_dtype, which
        # halves its vreg/VMEM footprint and the vld/vst traffic per layer.
        return y.astype(compute_dtype)

    h = dense(x_ref[...], w_in_ref, b_in_ref, relu=True, last=False)   # 'input'+'ReLU_1'
    for i in range(hidden_layers):
        # OrderedDict key-reuse quirk: for hidden_layers >= 2 the hidden layer
        # i==1 has NO ReLU after it (its 'ReLU_1' slot sits right after 'input').
        relu = not (i == 1 and hidden_layers >= 2)
        h = dense(h, hid_refs[2 * i], hid_refs[2 * i + 1], relu=relu, last=False)
    out = dense(h, w_out_ref, b_out_ref, relu=False, last=True)        # 'output'
    o_ref[...] = out.astype(o_ref.dtype)


# ---------------------------------------------------------------------------
# Parameter init (PyTorch nn.Linear default: U(-1/sqrt(fan_in), +1/sqrt(fan_in)))
# Weights stored as [in, out] (transpose of PyTorch's [out, in]) so the kernel
# computes y = x @ W + b directly on the MXU.
# ---------------------------------------------------------------------------
def init_linear(key, fan_in, fan_out, dtype=jnp.float32):
    kw, kb = jax.random.split(key)
    bound = float(fan_in) ** -0.5
    w = jax.random.uniform(kw, (fan_in, fan_out), dtype, -bound, bound)
    b = jax.random.uniform(kb, (fan_out,), dtype, -bound, bound)
    return w, b


def init_dnn_params(key, input_nodes, hidden_nodes, output_nodes, hidden_layers):
    params = {}
    key, k = jax.random.split(key)
    params["input"] = init_linear(k, input_nodes, hidden_nodes)
    for i in range(hidden_layers):
        key, k = jax.random.split(key)
        params[f"hidden_{i}"] = init_linear(k, hidden_nodes, hidden_nodes)
    key, k = jax.random.split(key)
    params["output"] = init_linear(k, hidden_nodes, output_nodes)
    return params


def pack_dnn_params(params, hidden_layers, compute_dtype=jnp.bfloat16):
    """One-time packing: pad to lane-dense shapes (feature dims -> multiple of
    128), cast weights to the matmul dtype, keep biases f32 pre-shaped (1, N).
    Zero padding is mathematically exact (zero columns contribute 0 to every
    dot and ReLU(0)=0); padding is sliced away after the kernel."""

    def pad_w(w):
        k, n = w.shape
        kp, np_ = _round_up(k, 128), _round_up(n, 128)
        return jnp.pad(w, ((0, kp - k), (0, np_ - n))).astype(compute_dtype)

    def pad_b(b):
        n = b.shape[0]
        np_ = _round_up(n, 128)
        return jnp.pad(b, (0, np_ - n)).reshape(1, np_).astype(jnp.float32)

    tensors = []
    w, b = params["input"]
    tensors += [pad_w(w), pad_b(b)]
    for i in range(hidden_layers):
        w, b = params[f"hidden_{i}"]
        tensors += [pad_w(w), pad_b(b)]
    w, b = params["output"]
    tensors += [pad_w(w), pad_b(b)]

    return {
        "tensors": tensors,
        "input_nodes": params["input"][0].shape[0],
        "output_nodes": params["output"][0].shape[1],
        "compute_dtype": compute_dtype,
    }


def _vmem_limit_bytes(tensors, TM, Kp, Hp, Np, x_itemsize):
    """Explicit VMEM budget.  Weights are counted double-buffered (conservative:
    Mosaic skips the re-DMA for grid-invariant blocks but may still allocate two
    buffers), plus double-buffered x/out blocks and f32 temporaries.  Clamp to
    [16 MiB, 64 MiB] so the limit is valid on v5e (16 MiB scoped default),
    v6e (128 MiB physical) and v7x (64 MiB physical)."""
    weight_bytes = 2 * sum(int(t.size) * t.dtype.itemsize for t in tensors)
    io_bytes = 2 * TM * Kp * x_itemsize + 2 * TM * Np * 4
    act_bytes = 4 * TM * Hp * 4
    est = weight_bytes + io_bytes + act_bytes
    return int(min(max(2 * est, 16 * 1024 * 1024), 64 * 1024 * 1024))


# ---------------------------------------------------------------------------
# Forward pass: single fused pallas_call, then slice off padding + view(-1).
# ---------------------------------------------------------------------------
def dnn_forward(x, packed, hidden_layers):
    tensors = packed["tensors"]
    out_nodes = packed["output_nodes"]
    compute_dtype = packed["compute_dtype"]

    M, K = x.shape
    Kp = tensors[0].shape[0]          # padded input features
    Hp = tensors[0].shape[1]          # padded hidden width
    Np = tensors[-2].shape[1]         # padded output features (lane-dense out)

    itemsize = tensors[0].dtype.itemsize          # bytes of compute_dtype
    m_align = max(8, 32 // itemsize)              # f32->8, bf16->16 (packed sublanes)

    # Batch tiling: small batches run as a single grid step (latency-bound);
    # large batches use 256-row tiles (full 256-wide MXU on v6e/v7x) and give
    # >= 2 grid steps whenever M > 256 so both v7x TensorCores get work.
    if M <= 256:
        Mp = _round_up(M, m_align)
        TM = Mp
    else:
        TM = 256
        Mp = _round_up(M, TM)

    # Cast to compute_dtype ONCE here (halves input-side HBM traffic vs f32)
    # and skip the pad entirely when already aligned.
    if Mp == M and Kp == K and x.dtype == compute_dtype:
        xp = x
    else:
        xp = jnp.pad(x.astype(compute_dtype), ((0, Mp - M), (0, Kp - K)))

    in_specs = [pl.BlockSpec((TM, Kp), lambda m: (m, 0))]
    for t in tensors:
        # Grid-invariant block index -> weights/biases stay VMEM-resident; the
        # Mosaic pipeline skips the redundant DMA across batch blocks.
        in_specs.append(pl.BlockSpec(t.shape, lambda m: (0, 0)))

    kernel = functools.partial(
        _fused_mlp_kernel, hidden_layers=hidden_layers, compute_dtype=compute_dtype)

    out_padded = pl.pallas_call(
        kernel,
        out_shape=jax.ShapeDtypeStruct((Mp, Np), jnp.float32),
        grid=(Mp // TM,),
        in_specs=in_specs,
        out_specs=pl.BlockSpec((TM, Np), lambda m: (m, 0)),
        compiler_params=pltpu.CompilerParams(
            dimension_semantics=("parallel",),
            vmem_limit_bytes=_vmem_limit_bytes(tensors, TM, Kp, Hp, Np, itemsize)),
    )(xp, *tensors)

    # Drop padding, flatten like the module's `x.view(-1)`.
    return out_padded[:M, :out_nodes].reshape(-1)


# ---------------------------------------------------------------------------
# Pure-JAX reference (f32) for correctness checks.
# ---------------------------------------------------------------------------
def dnn_forward_ref(x, params, hidden_layers):
    w, b = params["input"]
    h = jnp.maximum(x @ w + b, 0.0)
    for i in range(hidden_layers):
        w, b = params[f"hidden_{i}"]
        h = h @ w + b
        if not (i == 1 and hidden_layers >= 2):
            h = jnp.maximum(h, 0.0)
    w, b = params["output"]
    return (h @ w + b).reshape(-1)


if __name__ == "__main__":
    # Small shapes consistent with the module's forward (2-D input to nn.Linear).
    batch = 4
    input_nodes, hidden_nodes, output_nodes, hidden_layers = 16, 32, 4, 2

    key = jax.random.PRNGKey(0)
    key, kx = jax.random.split(key)
    x = jax.random.normal(kx, (batch, input_nodes), dtype=jnp.float32)
    params = init_dnn_params(key, input_nodes, hidden_nodes, output_nodes,
                             hidden_layers)

    ref = dnn_forward_ref(x, params, hidden_layers)

    # 1) f32 compute path: exact-semantics check (padding is mathematically exact).
    packed_f32 = pack_dnn_params(params, hidden_layers, compute_dtype=jnp.float32)
    out_f32 = jax.block_until_ready(dnn_forward(x, packed_f32, hidden_layers))
    assert out_f32.shape == (batch * output_nodes,), out_f32.shape
    assert jnp.allclose(out_f32, ref, atol=1e-4, rtol=1e-4), \
        float(jnp.max(jnp.abs(out_f32 - ref)))

    # 2) bf16 weights + bf16 inter-layer activations (default): intentional
    #    precision deviation from the f32 PyTorch module, covered by relaxed
    #    tolerances; all matmuls accumulate in f32.
    packed_bf16 = pack_dnn_params(params, hidden_layers, compute_dtype=jnp.bfloat16)
    out_bf16 = jax.block_until_ready(dnn_forward(x, packed_bf16, hidden_layers))
    assert out_bf16.shape == (batch * output_nodes,), out_bf16.shape
    assert jnp.allclose(out_bf16, ref, atol=5e-2, rtol=5e-2), \
        float(jnp.max(jnp.abs(out_bf16 - ref)))

    # 3) Large-batch path: TM=256, multi-step "parallel" grid, row padding.
    #    f32 compute so the check is exact.
    key, kx2 = jax.random.split(key)
    x_big = jax.random.normal(kx2, (272, input_nodes), dtype=jnp.float32)
    ref_big = dnn_forward_ref(x_big, params, hidden_layers)
    out_big = jax.block_until_ready(dnn_forward(x_big, packed_f32, hidden_layers))
    assert out_big.shape == (272 * output_nodes,), out_big.shape
    assert jnp.allclose(out_big, ref_big, atol=1e-4, rtol=1e-4), \
        float(jnp.max(jnp.abs(out_big - ref_big)))

    print("KERNEL_OK")
</pallas_src>

<mosaic_0001>
module attributes {stable_mosaic.version = 11 : i64} {
  func.func @_fused_mlp_kernel(%arg0: i32, %arg1: memref<8x128xf32, #tpu.memory_space<vmem>>, %arg2: memref<128x128xf32, #tpu.memory_space<vmem>>, %arg3: memref<1x128xf32, #tpu.memory_space<vmem>>, %arg4: memref<128x128xf32, #tpu.memory_space<vmem>>, %arg5: memref<1x128xf32, #tpu.memory_space<vmem>>, %arg6: memref<128x128xf32, #tpu.memory_space<vmem>>, %arg7: memref<1x128xf32, #tpu.memory_space<vmem>>, %arg8: memref<128x128xf32, #tpu.memory_space<vmem>>, %arg9: memref<1x128xf32, #tpu.memory_space<vmem>>, %arg10: memref<8x128xf32, #tpu.memory_space<vmem>>) attributes {dimension_semantics = [#tpu.dimension_semantics<parallel>], iteration_bounds = array<i64: 1>, scalar_prefetch = 0 : i64, scratch_operands = 0 : i64, tpu.core_type = #tpu.core_type<tc>, window_params = [{transform_indices = @transform_0, window_bounds = array<i64: 8, 128>}, {pipeline_mode = #tpu.pipeline_mode<synchronous>, transform_indices = @transform_1, window_bounds = array<i64: 128, 128>}, {pipeline_mode = #tpu.pipeline_mode<synchronous>, transform_indices = @transform_2, window_bounds = array<i64: 1, 128>}, {pipeline_mode = #tpu.pipeline_mode<synchronous>, transform_indices = @transform_3, window_bounds = array<i64: 128, 128>}, {pipeline_mode = #tpu.pipeline_mode<synchronous>, transform_indices = @transform_4, window_bounds = array<i64: 1, 128>}, {pipeline_mode = #tpu.pipeline_mode<synchronous>, transform_indices = @transform_5, window_bounds = array<i64: 128, 128>}, {pipeline_mode = #tpu.pipeline_mode<synchronous>, transform_indices = @transform_6, window_bounds = array<i64: 1, 128>}, {pipeline_mode = #tpu.pipeline_mode<synchronous>, transform_indices = @transform_7, window_bounds = array<i64: 128, 128>}, {pipeline_mode = #tpu.pipeline_mode<synchronous>, transform_indices = @transform_8, window_bounds = array<i64: 1, 128>}, {transform_indices = @transform_9, window_bounds = array<i64: 8, 128>}]} {
    %c0 = arith.constant 0 : index
    %c0_0 = arith.constant 0 : index
    %0 = vector.load %arg1[%c0, %c0_0] : memref<8x128xf32, #tpu.memory_space<vmem>>, vector<8x128xf32>
    %c0_1 = arith.constant 0 : index
    %c0_2 = arith.constant 0 : index
    %1 = vector.load %arg2[%c0_1, %c0_2] : memref<128x128xf32, #tpu.memory_space<vmem>>, vector<128x128xf32>
    %cst = arith.constant dense<0.000000e+00> : vector<8x128xf32>
    %2 = tpu.matmul %0, %1, %cst {dimension_numbers = #tpu.dot_dimension_numbers<[1], [0], [0], [1], [0, 0, 1, 1], [], []>} : vector<8x128xf32>, vector<128x128xf32>, vector<8x128xf32> -> vector<8x128xf32>
    %c0_3 = arith.constant 0 : index
    %c0_4 = arith.constant 0 : index
    %3 = vector.load %arg3[%c0_3, %c0_4] : memref<1x128xf32, #tpu.memory_space<vmem>>, vector<1x128xf32>
    %4 = vector.broadcast %3 : vector<1x128xf32> to vector<8x128xf32>
    %5 = arith.addf %2, %4 : vector<8x128xf32>
    %cst_5 = arith.constant 0.000000e+00 : f32
    %6 = vector.broadcast %cst_5 : f32 to vector<8x128xf32>
    %7 = arith.maximumf %5, %6 : vector<8x128xf32>
    %c0_6 = arith.constant 0 : index
    %c0_7 = arith.constant 0 : index
    %8 = vector.load %arg4[%c0_6, %c0_7] : memref<128x128xf32, #tpu.memory_space<vmem>>, vector<128x128xf32>
    %cst_8 = arith.constant dense<0.000000e+00> : vector<8x128xf32>
    %9 = tpu.matmul %7, %8, %cst_8 {dimension_numbers = #tpu.dot_dimension_numbers<[1], [0], [0], [1], [0, 0, 1, 1], [], []>} : vector<8x128xf32>, vector<128x128xf32>, vector<8x128xf32> -> vector<8x128xf32>
    %c0_9 = arith.constant 0 : index
    %c0_10 = arith.constant 0 : index
    %10 = vector.load %arg5[%c0_9, %c0_10] : memref<1x128xf32, #tpu.memory_space<vmem>>, vector<1x128xf32>
    %11 = vector.broadcast %10 : vector<1x128xf32> to vector<8x128xf32>
    %12 = arith.addf %9, %11 : vector<8x128xf32>
    %cst_11 = arith.constant 0.000000e+00 : f32
    %13 = vector.broadcast %cst_11 : f32 to vector<8x128xf32>
    %14 = arith.maximumf %12, %13 : vector<8x128xf32>
    %c0_12 = arith.constant 0 : index
    %c0_13 = arith.constant 0 : index
    %15 = vector.load %arg6[%c0_12, %c0_13] : memref<128x128xf32, #tpu.memory_space<vmem>>, vector<128x128xf32>
    %cst_14 = arith.constant dense<0.000000e+00> : vector<8x128xf32>
    %16 = tpu.matmul %14, %15, %cst_14 {dimension_numbers = #tpu.dot_dimension_numbers<[1], [0], [0], [1], [0, 0, 1, 1], [], []>} : vector<8x128xf32>, vector<128x128xf32>, vector<8x128xf32> -> vector<8x128xf32>
    %c0_15 = arith.constant 0 : index
    %c0_16 = arith.constant 0 : index
    %17 = vector.load %arg7[%c0_15, %c0_16] : memref<1x128xf32, #tpu.memory_space<vmem>>, vector<1x128xf32>
    %18 = vector.broadcast %17 : vector<1x128xf32> to vector<8x128xf32>
    %19 = arith.addf %16, %18 : vector<8x128xf32>
    %c0_17 = arith.constant 0 : index
    %c0_18 = arith.constant 0 : index
    %20 = vector.load %arg8[%c0_17, %c0_18] : memref<128x128xf32, #tpu.memory_space<vmem>>, vector<128x128xf32>
    %cst_19 = arith.constant dense<0.000000e+00> : vector<8x128xf32>
    %21 = tpu.matmul %19, %20, %cst_19 {dimension_numbers = #tpu.dot_dimension_numbers<[1], [0], [0], [1], [0, 0, 1, 1], [], []>} : vector<8x128xf32>, vector<128x128xf32>, vector<8x128xf32> -> vector<8x128xf32>
    %c0_20 = arith.constant 0 : index
    %c0_21 = arith.constant 0 : index
    %22 = vector.load %arg9[%c0_20, %c0_21] : memref<1x128xf32, #tpu.memory_space<vmem>>, vector<1x128xf32>
    %23 = vector.broadcast %22 : vector<1x128xf32> to vector<8x128xf32>
    %24 = arith.addf %21, %23 : vector<8x128xf32>
    %c0_22 = arith.constant 0 : index
    %c0_23 = arith.constant 0 : index
    %25 = vector.load %arg10[%c0_22, %c0_23] : memref<8x128xf32, #tpu.memory_space<vmem>>, vector<8x128xf32>
    tpu.vector_store %arg10[%c0_22, %c0_23], %24 {strides = array<i32>} : memref<8x128xf32, #tpu.memory_space<vmem>>, vector<8x128xf32>,
    return
  }
  func.func @transform_0(%arg0: i32) -> (i32, i32) {
    %c0_i32 = arith.constant 0 : i32
    %c0_i32_0 = arith.constant 0 : i32
    return %arg0, %c0_i32 : i32, i32
  }
  func.func @transform_1(%arg0: i32) -> (i32, i32) {
    %c0_i32 = arith.constant 0 : i32
    %c0_i32_0 = arith.constant 0 : i32
    %c0_i32_1 = arith.constant 0 : i32
    return %c0_i32, %c0_i32_0 : i32, i32
  }
  func.func @transform_2(%arg0: i32) -> (i32, i32) {
    %c0_i32 = arith.constant 0 : i32
    %c0_i32_0 = arith.constant 0 : i32
    %c0_i32_1 = arith.constant 0 : i32
    return %c0_i32, %c0_i32_0 : i32, i32
  }
  func.func @transform_3(%arg0: i32) -> (i32, i32) {
    %c0_i32 = arith.constant 0 : i32
    %c0_i32_0 = arith.constant 0 : i32
    %c0_i32_1 = arith.constant 0 : i32
    return %c0_i32, %c0_i32_0 : i32, i32
  }
  func.func @transform_4(%arg0: i32) -> (i32, i32) {
    %c0_i32 = arith.constant 0 : i32
    %c0_i32_0 = arith.constant 0 : i32
    %c0_i32_1 = arith.constant 0 : i32
    return %c0_i32, %c0_i32_0 : i32, i32
  }
  func.func @transform_5(%arg0: i32) -> (i32, i32) {
    %c0_i32 = arith.constant 0 : i32
    %c0_i32_0 = arith.constant 0 : i32
    %c0_i32_1 = arith.constant 0 : i32
    return %c0_i32, %c0_i32_0 : i32, i32
  }
  func.func @transform_6(%arg0: i32) -> (i32, i32) {
    %c0_i32 = arith.constant 0 : i32
    %c0_i32_0 = arith.constant 0 : i32
    %c0_i32_1 = arith.constant 0 : i32
    return %c0_i32, %c0_i32_0 : i32, i32
  }
  func.func @transform_7(%arg0: i32) -> (i32, i32) {
    %c0_i32 = arith.constant 0 : i32
    %c0_i32_0 = arith.constant 0 : i32
    %c0_i32_1 = arith.constant 0 : i32
    return %c0_i32, %c0_i32_0 : i32, i32
  }
  func.func @transform_8(%arg0: i32) -> (i32, i32) {
    %c0_i32 = arith.constant 0 : i32
    %c0_i32_0 = arith.constant 0 : i32
    %c0_i32_1 = arith.constant 0 : i32
    return %c0_i32, %c0_i32_0 : i32, i32
  }
  func.func @transform_9(%arg0: i32) -> (i32, i32) {
    %c0_i32 = arith.constant 0 : i32
    %c0_i32_0 = arith.constant 0 : i32
    return %arg0, %c0_i32 : i32, i32
  }
}

</mosaic_0001>

<bundles_post_ra>
// kernel: tpu_custom_call.1
= control target key start
LH: loop header
LB: loop body
LE: loop exit
PB: predicated region body
PF: predicated region fallthrough
CT: control target
= control target key end

     0   :  { %14 = vsyncpa [#allocation3], 0  ;;  %s1016_s0 = inlined_call_operand.hbm [shape: f32[8,128], index: 0, kind: input, shape index: {}]   ;;  %s1017_s1 = inlined_call_operand.hbm [shape: f32[128,128], index: 1, kind: input, shape index: {}]   ;;  %s1018_s2 = inlined_call_operand.vmem [shape: f32[1,128], index: 2, kind: input, shape index: {}]   ;;  %s1019_s3 = inlined_call_operand.hbm [shape: f32[128,128], index: 3, kind: input, shape index: {}]   ;;  %s1020_s4 = inlined_call_operand.vmem [shape: f32[1,128], index: 4, kind: input, shape index: {}]   ;;  %s1021_s5 = inlined_call_operand.hbm [shape: f32[128,128], index: 5, kind: input, shape index: {}]   ;;  %s1022_s6 = inlined_call_operand.vmem [shape: f32[1,128], index: 6, kind: input, shape index: {}]   ;;  %s1023_s7 = inlined_call_operand.hbm [shape: f32[128,128], index: 7, kind: input, shape index: {}]   ;;  %s1024_s8 = inlined_call_operand.vmem [shape: f32[1,128], index: 8, kind: input, shape index: {}]   ;;  %s1025_s9 = inlined_call_operand.hbm [shape: f32[8,128], index: 9, kind: output, shape index: {}]  }
   0x1   :  { %15 = vsyncpa [#allocation6], 0 }
   0x2   :  { %16 = vsyncpa [#allocation9], 0 }
   0x3   :  { %17 = vsyncpa [#allocation4], 0  ;;  %s842_s30 = smov [#allocation5]  }
   0x4   :  { %s33_s10 = sshll.u32 %s842_s30, 4  ;;  %s34_s10 = int_to_ptr.vmem [resolvable:$true] %s33_s10 }
   0x5   :  { %s722_s11 = scalar_lea.vmem %s34_s10, 2048  ;;  %p727_p1 = scmp.lt.s32.totalorder %s34_s10, %s34_s10 }
   0x6   :  { %p723_p0 = scmp.ne.s32.totalorder %s34_s10, %s722_s11  ;;  %p728_p2 = scmp.lt.s32.totalorder %s722_s11, %s722_s11 }
   0x8   :  { %p729_p3 = por %p728_p2, %p727_p1 }
   0xa   :  { %p730_p4 = pnand %p729_p3, %p723_p0 }
   0xc   :  { %733 = shalt.err (!%p730_p4)
}
   0xd   :  { %s843_s12 = smov 128   ;;  %s844_s13 = smov 8  }
   0xe   :  { %39 = dma.hbm_to_vmem [thread:$0]  %s1017_s1, 2048, %s34_s10, [#allocation6], %s843_s12, %s843_s12, %s844_s13  }
   0xf   :  { %s845_s16 = smov [#allocation8]   ;;  %s846_s18 = smov [#allocation2]  }
  0x10   :  { %s61_s17 = sshll.u32 %s845_s16, 4  ;;  %s24_s19 = sshll.u32 %s846_s18, 4  ;;  %s62_s17 = int_to_ptr.vmem [resolvable:$true] %s61_s17  ;;  %s25_s19 = int_to_ptr.vmem [resolvable:$true] %s24_s19 }
  0x11   :  { %s742_s20 = scalar_lea.vmem %s62_s17, 2048  ;;  %p747_p6 = scmp.lt.s32.totalorder %s62_s17, %s62_s17 }
  0x12   :  { %p743_p5 = scmp.ne.s32.totalorder %s62_s17, %s742_s20  ;;  %p748_p7 = scmp.lt.s32.totalorder %s742_s20, %s742_s20 }
  0x14   :  { %p749_p8 = por %p748_p7, %p747_p6 }
  0x16   :  { %p750_p9 = pnand %p749_p8, %p743_p5 }
  0x18   :  { %753 = shalt.err (!%p750_p9)
}
  0x19   :  { %67 = dma.hbm_to_vmem [thread:$0]  %s1021_s5, 2048, %s62_s17, [#allocation9], %s843_s12, %s843_s12, %s844_s13  }
  0x1a   :  { %s762_s1 = scalar_lea.vmem %s25_s19, 128  ;;  %p767_p11 = scmp.lt.s32.totalorder %s25_s19, %s25_s19 }
  0x1b   :  { %p763_p10 = scmp.ne.s32.totalorder %s25_s19, %s762_s1  ;;  %p768_p12 = scmp.lt.s32.totalorder %s762_s1, %s762_s1 }
  0x1d   :  { %p769_p13 = por %p768_p12, %p767_p11 }
  0x1f   :  { %p770_p0 = pnand %p769_p13, %p763_p10 }
  0x21   :  { %773 = shalt.err (!%p770_p0)
}
  0x22   :  { %27 = dma.hbm_to_vmem [thread:$0]  %s1016_s0, 128, %s25_s19, [#allocation3]  }
  0x23   :  { %s847_s25 = smov [#allocation7]   ;;  %s848_s27 = smov [#allocation10]  }
  0x24   :  { %s47_s26 = sshll.u32 %s847_s25, 4  ;;  %s75_s28 = sshll.u32 %s848_s27, 4  ;;  %s48_s26 = int_to_ptr.vmem [resolvable:$true] %s47_s26  ;;  %s76_s28 = int_to_ptr.vmem [resolvable:$true] %s75_s28 }
  0x25   :  { %s782_s29 = scalar_lea.vmem %s48_s26, 2048  ;;  %p787_p2 = scmp.lt.s32.totalorder %s48_s26, %s48_s26 }
  0x26   :  { %p783_p1 = scmp.ne.s32.totalorder %s48_s26, %s782_s29  ;;  %p788_p3 = scmp.lt.s32.totalorder %s782_s29, %s782_s29 }
  0x28   :  { %p789_p4 = por %p788_p3, %p787_p2 }
  0x2a   :  { %p790_p5 = pnand %p789_p4, %p783_p1 }
  0x2c   :  { %793 = shalt.err (!%p790_p5)
}
  0x2d   :  { %53 = dma.hbm_to_vmem [thread:$0]  %s1019_s3, 2048, %s48_s26, [#allocation6], %s843_s12, %s843_s12, %s844_s13  }
  0x2e   :  { %s802_s0 = scalar_lea.vmem %s76_s28, 2048  ;;  %p807_p7 = scmp.lt.s32.totalorder %s76_s28, %s76_s28 }
  0x2f   :  { %p803_p6 = scmp.ne.s32.totalorder %s76_s28, %s802_s0  ;;  %p808_p8 = scmp.lt.s32.totalorder %s802_s0, %s802_s0 }
  0x31   :  { %p809_p9 = por %p808_p8, %p807_p7 }
  0x33   :  { %p810_p10 = pnand %p809_p9, %p803_p6 }
  0x35   :  { %813 = shalt.err (!%p810_p10)
}
  0x36   :  { %81 = dma.hbm_to_vmem [thread:$0]  %s1023_s7, 2048, %s76_s28, [#allocation9], %s843_s12, %s843_s12, %s844_s13  }
  0x37   :  { %834 = dma.done.wait [#allocation3], 128  }
  0x38   :  { %835 = vsyncadd [#allocation3], 4294967168 }
  0x39   :  { %836 = dma.done.wait [#allocation6], 4096  }
  0x3a   :  { %837 = vsyncadd [#allocation6], 4294963200 }
  0x3b   :  { %838 = dma.done.wait [#allocation9], 4096  }
  0x3c   :  { %839 = vsyncadd [#allocation9], 4294963200  ;;  %v849_v0 = vmov 0.0   ;;  %vm850_vm0 = vmmov 0   ;;  %v115_v1 = vld [vmem:[#allocation5 + $0x78] sm:$0xff]  ;;  %v114_v2 = vld [vmem:[#allocation5 + $0x70] sm:$0xff] }
  0x3d   :  { %564 = vmatprep.subr.mxu0 %v849_v0  ;;  %596 = vmatprep.mubr.msk.f32.mxu0 %vm850_vm0, %v849_v0  ;;  %v113_v3 = vld [vmem:[#allocation5 + $0x68] sm:$0xff]  ;;  %v112_v4 = vld [vmem:[#allocation5 + $0x60] sm:$0xff]  ;;  %v209_v5 = vld [vmem:[#allocation7 + $0x78] sm:$0xff]  ;;  %s851_s16 = smov [#allocation11]  }
  0x3e   :  { %599 = vmatprep.subr.mxu1 %v849_v0  ;;  %631 = vmatprep.mubr.msk.f32.mxu1 %vm850_vm0, %v849_v0  ;;  %v111_v6 = vld [vmem:[#allocation5 + $0x58] sm:$0xff]  ;;  %v208_v7 = vld [vmem:[#allocation7 + $0x70] sm:$0xff]  ;;  %v207_v8 = vld [vmem:[#allocation7 + $0x68] sm:$0xff]  ;;  %s481_s17 = sshll.u32 %s851_s16, 4  ;;  %s482_s17 = int_to_ptr.vmem [resolvable:$true] %s481_s17 }
  0x3f   :  { %565 = vmatpush3.msra.mxu0 %v115_v1  ;;  %600 = vmatpush3.msra.mxu1 %v209_v5  ;;  %v110_v9 = vld [vmem:[#allocation5 + $0x50] sm:$0xff]  ;;  %v206_v10 = vld [vmem:[#allocation7 + $0x60] sm:$0xff]  ;;  %v109_v11 = vld [vmem:[#allocation5 + $0x48] sm:$0xff]  ;;  %s814_s18 = scalar_lea.vmem %s482_s17, 128  ;;  %p819_p12 = scmp.lt.s32.totalorder %s482_s17, %s482_s17 }
  0x40   :  { %566 = vmatprep.subr.mxu0 %v849_v0  ;;  %601 = vmatprep.subr.mxu1 %v849_v0  ;;  %v205_v12 = vld [vmem:[#allocation7 + $0x58] sm:$0xff]  ;;  %v108_v13 = vld [vmem:[#allocation5 + $0x40] sm:$0xff]  ;;  %v204_v14 = vld [vmem:[#allocation7 + $0x50] sm:$0xff]  ;;  %p815_p11 = scmp.ne.s32.totalorder %s482_s17, %s814_s18  ;;  %p820_p13 = scmp.lt.s32.totalorder %s814_s18, %s814_s18 }
  0x41   :  { %567 = vmatpush3.msra.mxu0 %v114_v2  ;;  %602 = vmatpush3.msra.mxu1 %v208_v7  ;;  %v107_v15 = vld [vmem:[#allocation5 + $0x38] sm:$0xff]  ;;  %v203_v16 = vld [vmem:[#allocation7 + $0x48] sm:$0xff]  ;;  %v106_v17 = vld [vmem:[#allocation5 + $0x30] sm:$0xff] }
  0x42   :  { %568 = vmatprep.subr.mxu0 %v849_v0  ;;  %603 = vmatprep.subr.mxu1 %v849_v0  ;;  %v202_v18 = vld [vmem:[#allocation7 + $0x40] sm:$0xff]  ;;  %v105_v19 = vld [vmem:[#allocation5 + $0x28] sm:$0xff]  ;;  %v201_v20 = vld [vmem:[#allocation7 + $0x38] sm:$0xff]  ;;  %p821_p0 = por %p820_p13, %p819_p12 }
  0x43   :  { %569 = vmatpush3.msra.mxu0 %v113_v3  ;;  %604 = vmatpush3.msra.mxu1 %v207_v8  ;;  %v104_v21 = vld [vmem:[#allocation5 + $0x20] sm:$0xff]  ;;  %v200_v22 = vld [vmem:[#allocation7 + $0x30] sm:$0xff]  ;;  %v103_v23 = vld [vmem:[#allocation5 + $0x18] sm:$0xff] }
  0x44   :  { %570 = vmatprep.subr.mxu0 %v849_v0  ;;  %605 = vmatprep.subr.mxu1 %v849_v0  ;;  %v199_v24 = vld [vmem:[#allocation7 + $0x28] sm:$0xff]  ;;  %v102_v25 = vld [vmem:[#allocation5 + $0x10] sm:$0xff]  ;;  %v198_v26 = vld [vmem:[#allocation7 + $0x20] sm:$0xff]  ;;  %p822_p1 = pnand %p821_p0, %p815_p11 }
  0x45   :  { %571 = vmatpush3.msra.mxu0 %v112_v4  ;;  %606 = vmatpush3.msra.mxu1 %v206_v10  ;;  %v101_v27 = vld [vmem:[#allocation5 + $0x8] sm:$0xff]  ;;  %v197_v28 = vld [vmem:[#allocation7 + $0x18] sm:$0xff]  ;;  %v100_v29 = vld [vmem:[#allocation5] sm:$0xff] }
  0x46   :  { %572 = vmatprep.subr.mxu0 %v849_v0  ;;  %607 = vmatprep.subr.mxu1 %v849_v0  ;;  %v99_v30 = vld [vmem:[#allocation2] sm:$0xff]  ;;  %v196_v31 = vld [vmem:[#allocation7 + $0x10] sm:$0xff]  ;;  %v195_v32 = vld [vmem:[#allocation7 + $0x8] sm:$0xff] }
  0x47   :  { %573 = vmatpush3.msra.mxu0 %v111_v6  ;;  %608 = vmatpush3.msra.mxu1 %v205_v12  ;;  %v194_v33 = vld [vmem:[#allocation7] sm:$0xff]  ;;  %v303_v34 = vld [vmem:[#allocation8 + $0x78] sm:$0xff]  ;;  %v302_v35 = vld [vmem:[#allocation8 + $0x70] sm:$0xff] }
  0x48   :  { %574 = vmatprep.subr.mxu0 %v849_v0  ;;  %609 = vmatprep.subr.mxu1 %v849_v0  ;;  %v301_v36 = vld [vmem:[#allocation8 + $0x68] sm:$0xff]  ;;  %v300_v37 = vld [vmem:[#allocation8 + $0x60] sm:$0xff]  ;;  %v299_v38 = vld [vmem:[#allocation8 + $0x58] sm:$0xff] }
  0x49   :  { %575 = vmatpush3.msra.mxu0 %v110_v9  ;;  %610 = vmatpush3.msra.mxu1 %v204_v14  ;;  %v298_v39 = vld [vmem:[#allocation8 + $0x50] sm:$0xff]  ;;  %v297_v40 = vld [vmem:[#allocation8 + $0x48] sm:$0xff]  ;;  %v296_v41 = vld [vmem:[#allocation8 + $0x40] sm:$0xff] }
  0x4a   :  { %576 = vmatprep.subr.mxu0 %v849_v0  ;;  %611 = vmatprep.subr.mxu1 %v849_v0  ;;  %v295_v42 = vld [vmem:[#allocation8 + $0x38] sm:$0xff]  ;;  %v294_v43 = vld [vmem:[#allocation8 + $0x30] sm:$0xff]  ;;  %v293_v44 = vld [vmem:[#allocation8 + $0x28] sm:$0xff] }
  0x4b   :  { %577 = vmatpush3.msra.mxu0 %v109_v11  ;;  %612 = vmatpush3.msra.mxu1 %v203_v16  ;;  %v292_v45 = vld [vmem:[#allocation8 + $0x20] sm:$0xff]  ;;  %v291_v46 = vld [vmem:[#allocation8 + $0x18] sm:$0xff]  ;;  %v290_v52 = vld [vmem:[#allocation8 + $0x10] sm:$0xff] }
  0x4c   :  { %578 = vmatprep.subr.mxu0 %v849_v0  ;;  %613 = vmatprep.subr.mxu1 %v849_v0  ;;  %v492_v47 = vld [vmem:[%s1018_s2] ss:$0 sm:$0xff]  ;;  %v289_v53 = vld [vmem:[#allocation8 + $0x8] sm:$0xff]  ;;  %v288_v54 = vld [vmem:[#allocation8] sm:$0xff] }
  0x4d   :  { %579 = vmatpush3.msra.mxu0 %v108_v13  ;;  %614 = vmatpush3.msra.mxu1 %v202_v18  ;;  %v396_v55 = vld [vmem:[#allocation10 + $0x78] sm:$0xff]  ;;  %v395_v56 = vld [vmem:[#allocation10 + $0x70] sm:$0xff]  ;;  %v394_v57 = vld [vmem:[#allocation10 + $0x68] sm:$0xff] }
  0x4e   :  { %580 = vmatprep.subr.mxu0 %v849_v0  ;;  %615 = vmatprep.subr.mxu1 %v849_v0  ;;  %v393_v58 = vld [vmem:[#allocation10 + $0x60] sm:$0xff]  ;;  %v392_v59 = vld [vmem:[#allocation10 + $0x58] sm:$0xff]  ;;  %v391_v60 = vld [vmem:[#allocation10 + $0x50] sm:$0xff] }
  0x4f   :  { %581 = vmatpush3.msra.mxu0 %v107_v15  ;;  %616 = vmatpush3.msra.mxu1 %v201_v20  ;;  %v390_v61 = vld [vmem:[#allocation10 + $0x48] sm:$0xff]  ;;  %v389_v62 = vld [vmem:[#allocation10 + $0x40] sm:$0xff]  ;;  %v388_v63 = vld [vmem:[#allocation10 + $0x38] sm:$0xff] }
  0x50   :  { %582 = vmatprep.subr.mxu0 %v849_v0  ;;  %617 = vmatprep.subr.mxu1 %v849_v0  ;;  %v387_v1 = vld [vmem:[#allocation10 + $0x30] sm:$0xff]  ;;  %v386_v2 = vld [vmem:[#allocation10 + $0x28] sm:$0xff]  ;;  %v385_v3 = vld [vmem:[#allocation10 + $0x20] sm:$0xff] }
  0x51   :  { %583 = vmatpush3.msra.mxu0 %v106_v17  ;;  %618 = vmatpush3.msra.mxu1 %v200_v22  ;;  %v384_v4 = vld [vmem:[#allocation10 + $0x18] sm:$0xff]  ;;  %v383_v5 = vld [vmem:[#allocation10 + $0x10] sm:$0xff]  ;;  %v382_v11 = vld [vmem:[#allocation10 + $0x8] sm:$0xff] }
  0x52   :  { %584 = vmatprep.subr.mxu0 %v849_v0  ;;  %619 = vmatprep.subr.mxu1 %v849_v0  ;;  %v493_v6 = vld [vmem:[%s1020_s4] ss:$0 sm:$0xff]  ;;  %v381_v12 = vld [vmem:[#allocation10] sm:$0xff] }
  0x53   :  { %585 = vmatpush3.msra.mxu0 %v105_v19  ;;  %620 = vmatpush3.msra.mxu1 %v199_v24  ;;  %v494_v13 = vld [vmem:[%s1022_s6] ss:$0 sm:$0xff] }
  0x54   :  { %586 = vmatprep.subr.mxu0 %v849_v0  ;;  %621 = vmatprep.subr.mxu1 %v849_v0  ;;  %v495_v17 = vld [vmem:[%s1024_s8] ss:$0 sm:$0xff] }
  0x55   :  { %587 = vmatpush3.msra.mxu0 %v104_v21  ;;  %622 = vmatpush3.msra.mxu1 %v198_v26 }
  0x56   :  { %588 = vmatprep.subr.mxu0 %v849_v0  ;;  %623 = vmatprep.subr.mxu1 %v849_v0 }
  0x57   :  { %589 = vmatpush3.msra.mxu0 %v103_v23  ;;  %624 = vmatpush3.msra.mxu1 %v197_v28 }
  0x58   :  { %590 = vmatprep.subr.mxu0 %v849_v0  ;;  %625 = vmatprep.subr.mxu1 %v849_v0 }
  0x59   :  { %591 = vmatpush3.msra.mxu0 %v102_v25  ;;  %626 = vmatpush3.msra.mxu1 %v196_v31 }
  0x5a   :  { %592 = vmatprep.subr.mxu0 %v849_v0  ;;  %627 = vmatprep.subr.mxu1 %v849_v0 }
  0x5b   :  { %593 = vmatpush3.msra.mxu0 %v101_v27  ;;  %628 = vmatpush3.msra.mxu1 %v195_v32 }
  0x5c   :  { %594 = vmatprep.subr.mxu0 %v849_v0  ;;  %629 = vmatprep.subr.mxu1 %v849_v0 }
  0x5d   :  { %595 = vmatpush3.msra.mxu0 %v100_v29  ;;  %630 = vmatpush3.msra.mxu1 %v194_v33 }
  0x5e   :  { %597 = vmatmul.mubr.f32.vlgmr.msra.gmra.mxu0 %v99_v30  ;;  %634 = vmatprep.subr.mxu0 %v849_v0 }
  0x5f   :  { %666 = vmatprep.mubr.msk.f32.mxu0 %vm850_vm0, %v849_v0  ;;  %669 = vmatprep.subr.mxu1 %v849_v0 }
  0x60   :  { %635 = vmatpush3.msra.mxu0 %v303_v34 }
  0x61   :  { %636 = vmatprep.subr.mxu0 %v849_v0 }
  0x62   :  { %637 = vmatpush3.msra.mxu0 %v302_v35 }
  0x63   :  { %638 = vmatprep.subr.mxu0 %v849_v0 }
  0x64   :  { %639 = vmatpush3.msra.mxu0 %v301_v36 }
  0x65   :  { %640 = vmatprep.subr.mxu0 %v849_v0 }
  0x66   :  { %641 = vmatpush3.msra.mxu0 %v300_v37 }
  0x67   :  { %642 = vmatprep.subr.mxu0 %v849_v0 }
  0x68   :  { %643 = vmatpush3.msra.mxu0 %v299_v38 }
  0x69   :  { %644 = vmatprep.subr.mxu0 %v849_v0 }
  0x6a   :  { %645 = vmatpush3.msra.mxu0 %v298_v39 }
  0x6b   :  { %646 = vmatprep.subr.mxu0 %v849_v0 }
  0x6c   :  { %647 = vmatpush3.msra.mxu0 %v297_v40 }
  0x6d   :  { %648 = vmatprep.subr.mxu0 %v849_v0 }
  0x6e   :  { %649 = vmatpush3.msra.mxu0 %v296_v41 }
  0x6f   :  { %650 = vmatprep.subr.mxu0 %v849_v0 }
  0x70   :  { %651 = vmatpush3.msra.mxu0 %v295_v42 }
  0x71   :  { %652 = vmatprep.subr.mxu0 %v849_v0 }
  0x72   :  { %653 = vmatpush3.msra.mxu0 %v294_v43 }
  0x73   :  { %654 = vmatprep.subr.mxu0 %v849_v0 }
  0x74   :  { %655 = vmatpush3.msra.mxu0 %v293_v44 }
  0x75   :  { %656 = vmatprep.subr.mxu0 %v849_v0 }
  0x76   :  { %657 = vmatpush3.msra.mxu0 %v292_v45 }
  0x77   :  { %658 = vmatprep.subr.mxu0 %v849_v0 }
  0x78   :  { %659 = vmatpush3.msra.mxu0 %v291_v46 }
  0x79   :  { %660 = vmatprep.subr.mxu0 %v849_v0 }
  0x7a   :  { %661 = vmatpush3.msra.mxu0 %v290_v52 }
  0x7b   :  { %662 = vmatprep.subr.mxu0 %v849_v0 }
  0x7c   :  { %663 = vmatpush3.msra.mxu0 %v289_v53 }
  0x7d   :  { %664 = vmatprep.subr.mxu0 %v849_v0 }
  0x7e   :  { %665 = vmatpush3.msra.mxu0 %v288_v54 }
 0x11e   :  { %v189_v48 = vpop.f32.mrf.mxu0 }
 0x11f   :  { %v190_v49 = vadd.f32 %v492_v47, %v189_v48 }
 0x120   :  { %v598_v50 = vpop.f32.mrf.mxu0 }
 0x121   :  { %v193_v51 = vmax.f32 %v190_v49, 0.0 }
 0x123   :  { %632 = vmatmul.mubr.f32.vlgmr.msra.gmra.mxu1 %v193_v51 }
 0x124   :  { %701 = vmatprep.mubr.msk.f32.mxu1 %vm850_vm0, %v849_v0  ;;  %670 = vmatpush3.msra.mxu1 %v396_v55 }
 0x125   :  { %671 = vmatprep.subr.mxu1 %v849_v0 }
 0x126   :  { %672 = vmatpush3.msra.mxu1 %v395_v56 }
 0x127   :  { %673 = vmatprep.subr.mxu1 %v849_v0 }
 0x128   :  { %674 = vmatpush3.msra.mxu1 %v394_v57 }
 0x129   :  { %675 = vmatprep.subr.mxu1 %v849_v0 }
 0x12a   :  { %676 = vmatpush3.msra.mxu1 %v393_v58 }
 0x12b   :  { %677 = vmatprep.subr.mxu1 %v849_v0 }
 0x12c   :  { %678 = vmatpush3.msra.mxu1 %v392_v59 }
 0x12d   :  { %679 = vmatprep.subr.mxu1 %v849_v0 }
 0x12e   :  { %680 = vmatpush3.msra.mxu1 %v391_v60 }
 0x12f   :  { %681 = vmatprep.subr.mxu1 %v849_v0 }
 0x130   :  { %682 = vmatpush3.msra.mxu1 %v390_v61 }
 0x131   :  { %683 = vmatprep.subr.mxu1 %v849_v0 }
 0x132   :  { %684 = vmatpush3.msra.mxu1 %v389_v62 }
 0x133   :  { %685 = vmatprep.subr.mxu1 %v849_v0 }
 0x134   :  { %686 = vmatpush3.msra.mxu1 %v388_v63 }
 0x135   :  { %687 = vmatprep.subr.mxu1 %v849_v0 }
 0x136   :  { %688 = vmatpush3.msra.mxu1 %v387_v1 }
 0x137   :  { %689 = vmatprep.subr.mxu1 %v849_v0 }
 0x138   :  { %690 = vmatpush3.msra.mxu1 %v386_v2 }
 0x139   :  { %691 = vmatprep.subr.mxu1 %v849_v0 }
 0x13a   :  { %692 = vmatpush3.msra.mxu1 %v385_v3 }
 0x13b   :  { %693 = vmatprep.subr.mxu1 %v849_v0 }
 0x13c   :  { %694 = vmatpush3.msra.mxu1 %v384_v4 }
 0x13d   :  { %695 = vmatprep.subr.mxu1 %v849_v0 }
 0x13e   :  { %696 = vmatpush3.msra.mxu1 %v383_v5 }
 0x13f   :  { %697 = vmatprep.subr.mxu1 %v849_v0 }
 0x140   :  { %698 = vmatpush3.msra.mxu1 %v382_v11 }
 0x141   :  { %699 = vmatprep.subr.mxu1 %v849_v0 }
 0x142   :  { %700 = vmatpush3.msra.mxu1 %v381_v12 }
 0x1e3   :  { %v283_v7 = vpop.f32.mrf.mxu1 }
 0x1e4   :  { %v284_v8 = vadd.f32 %v493_v6, %v283_v7 }
 0x1e5   :  { %v633_v9 = vpop.f32.mrf.mxu1 }
 0x1e6   :  { %v287_v10 = vmax.f32 %v284_v8, 0.0 }
 0x1e8   :  { %667 = vmatmul.mubr.f32.vlgmr.msra.gmra.mxu0 %v287_v10 }
 0x2a8   :  { %v377_v14 = vpop.f32.mrf.mxu0 }
 0x2a9   :  { %v378_v15 = vadd.f32 %v494_v13, %v377_v14 }
 0x2aa   :  { %v668_v16 = vpop.f32.mrf.mxu0 }
 0x2ab   :  { %702 = vmatmul.mubr.f32.vlgmr.msra.gmra.mxu1 %v378_v15 }
 0x36b   :  { %v470_v18 = vpop.f32.mrf.mxu1 }
 0x36c   :  { %v471_v19 = vadd.f32 %v495_v17, %v470_v18 }
 0x36d   :  { %v703_v0 = vpop.f32.mrf.mxu1 }
 0x36e   :  { %474 = vst [vmem:[#allocation11] sm:$0xff] %v471_v19 }
 0x36f   :  { %825 = shalt.err (!%p822_p1)
}
 0x370   :  { %484 = dma.vmem_to_hbm [thread:$0]  %s482_s17, 128, %s1025_s9, [#allocation4]  }
 0x371   :  { %840 = dma.done.wait [#allocation4], 128  }
 0x372   :  { %841 = vsyncadd [#allocation4], 4294967168 }
 0x373   :  { %488 = vsyncpa [#allocation3], 1 }
 0x374   :  { %489 = vsyncpa [#allocation6], 1 }
 0x375   :  { %490 = vsyncpa [#allocation9], 1 }
 0x376   :  { %491 = vsyncpa [#allocation4], 1 }

</bundles_post_ra>
